<compile_context>
chip_gen: v5e
topology: v5e:2x2
jax: 0.10.0
libtpu: 0.0.40
codegen_flags: <defaults>
</compile_context>

<pallas_src>
import jax
import jax.numpy as jnp
from jax import lax
from jax.experimental import pallas as pl
from jax.experimental.pallas import tpu as pltpu


def _round_up(x, m):
    return (x + m - 1) // m * m


def _cdiv(a, b):
    return -(-a // b)


def _tpu_vmem_capacity_bytes():
    try:
        return int(pltpu.get_tpu_info().vmem_capacity_bytes)
    except Exception:
        return 64 * 1024 * 1024          # conservative fallback (v7x-sized)


_BIG_VMEM = _tpu_vmem_capacity_bytes() >= 100 * 1024 * 1024   # v5e / v6e: 128 MiB
_VMEM_LIMIT = (96 if _BIG_VMEM else 48) * 1024 * 1024          # v7x: stay < 64 MiB


# ---------------------------------------------------------------------------
# Pallas kernels
# ---------------------------------------------------------------------------
def _elu_f32(x):
    # ELU(alpha=1): x if x > 0 else exp(x) - 1  (computed on f32 epilogue tiles)
    return jnp.where(x > 0, x, jnp.exp(jnp.minimum(x, 0.0)) - 1.0)


def _apply_act(x, act):
    if act == "elu":
        return _elu_f32(x)
    if act == "tanh":
        return jnp.tanh(x)
    return x


def _make_gemm_kernel(out_act, has_bias):
    """Single-K-block GEMM, f32 accumulation, fused bias + output activation."""
    if has_bias:
        def kernel(a_ref, b_ref, bias_ref, o_ref):
            acc = jnp.dot(a_ref[...], b_ref[...], preferred_element_type=jnp.float32)
            acc = _apply_act(acc + bias_ref[...], out_act)
            o_ref[...] = acc.astype(o_ref.dtype)
    else:
        def kernel(a_ref, b_ref, o_ref):
            acc = jnp.dot(a_ref[...], b_ref[...], preferred_element_type=jnp.float32)
            acc = _apply_act(acc, out_act)
            o_ref[...] = acc.astype(o_ref.dtype)
    return kernel


def _bn_stats_kernel(x_ref, sum_ref, sq_ref):
    # Per-channel sum / sum-of-squares; resident accumulators across row tiles,
    # channel-block axis is "parallel" (splits across TCs on v7x).
    @pl.when(pl.program_id(1) == 0)
    def _():
        sum_ref[...] = jnp.zeros_like(sum_ref)
        sq_ref[...] = jnp.zeros_like(sq_ref)
    x = x_ref[...].astype(jnp.float32)
    sum_ref[...] += jnp.sum(x, axis=0, keepdims=True)
    sq_ref[...] += jnp.sum(x * x, axis=0, keepdims=True)


def _make_bn_norm_kernel(inv_count, out_act):
    def kernel(x_ref, sum_ref, sq_ref, g_ref, b_ref, o_ref):
        x = x_ref[...].astype(jnp.float32)
        mean = sum_ref[...] * inv_count
        var = sq_ref[...] * inv_count - mean * mean      # biased var (training BN)
        inv = lax.rsqrt(jnp.maximum(var, 0.0) + 1e-5)
        y = (x - mean) * (inv * g_ref[...]) + b_ref[...]
        y = _apply_act(y, out_act)
        o_ref[...] = y.astype(o_ref.dtype)
    return kernel


# ---------------------------------------------------------------------------
# GEMM wrapper (fused bias / output activation, bf16 operands, f32 accumulation)
# ---------------------------------------------------------------------------
def _gemm_tiles(M, Kp, Np):
    # Lane-dense output tile; keep the full weight resident when modest.
    if Np <= 512:
        TN = Np
    elif Np % 256 == 0:
        TN = 256
    else:
        TN = 128
    if _BIG_VMEM:                              # v5e / v6e (128 MiB VMEM)
        tm_cap = 1024 if Kp <= 2048 else 512
    else:                                      # v7x (64 MiB VMEM)
        tm_cap = 512 if Kp <= 4096 else 256
    n_m = max(1, _cdiv(M, tm_cap))
    TM = _round_up(_cdiv(M, n_m), 16)          # multiple of 16: bf16 sublane packing
    return TM, TN, TM * n_m


def gemm_fused(a, w_p, bias_p, n_true, out_act=None, out_dtype=jnp.bfloat16):
    """(M,K)@(Kp,Np) (+bias) with fused output activation.
    a: bf16 (M,K); w_p/bias_p pre-packed & padded at parameter-build time."""
    M, K = a.shape
    Kp, Np = w_p.shape
    TM, TN, Mp = _gemm_tiles(M, Kp, Np)
    if Mp != M or Kp != K:
        a = jnp.pad(a, ((0, Mp - M), (0, Kp - K)))
    has_bias = bias_p is not None

    in_specs = [pl.BlockSpec((TM, Kp), lambda i, j: (i, 0)),
                pl.BlockSpec((Kp, TN), lambda i, j: (0, j))]
    args = [a, w_p]
    if has_bias:
        in_specs.append(pl.BlockSpec((1, TN), lambda i, j: (0, j)))
        args.append(bias_p)

    out = pl.pallas_call(
        _make_gemm_kernel(out_act, has_bias),
        out_shape=jax.ShapeDtypeStruct((Mp, Np), out_dtype),
        grid_spec=pltpu.PrefetchScalarGridSpec(
            num_scalar_prefetch=0,
            grid=(Mp // TM, Np // TN),
            in_specs=in_specs,
            out_specs=pl.BlockSpec((TM, TN), lambda i, j: (i, j)),
        ),
        compiler_params=pltpu.CompilerParams(
            dimension_semantics=("parallel", "parallel"),
            vmem_limit_bytes=_VMEM_LIMIT),
    )(*args)
    if Mp != M or Np != n_true:
        out = out[:M, :n_true]
    return out


# ---------------------------------------------------------------------------
# Conv / ConvTranspose (k=4, s=2, p=1) via im2col / sub-pixel + Pallas GEMM
# ---------------------------------------------------------------------------
def conv2d_s2(x, w_p, bias_p, cout, out_act=None, out_dtype=jnp.bfloat16):
    """Conv2d(k=4,s=2,p=1), NHWC. bf16 patches, fused GEMM, activation epilogue."""
    N, H, W, C = x.shape
    Ho, Wo = H // 2, W // 2
    xp = jnp.pad(x.astype(jnp.bfloat16), ((0, 0), (1, 1), (1, 1), (0, 0)))
    patches = [xp[:, kh:kh + 2 * Ho:2, kw:kw + 2 * Wo:2, :]
               for kh in range(4) for kw in range(4)]
    a = jnp.concatenate(patches, axis=-1).reshape(N * Ho * Wo, 16 * C)
    out = gemm_fused(a, w_p, bias_p, cout, out_act, out_dtype)
    return out.reshape(N, Ho, Wo, cout)


def conv_transpose2d_s2(x, w_p, bias_p, cout, out_act=None, out_dtype=jnp.bfloat16):
    """ConvTranspose2d(k=4,s=2,p=1), NHWC, via sub-pixel decomposition:
    one GEMM with K=4*Cin producing 4*Cout groups, then depth-to-space + crop."""
    N, H, W, C = x.shape
    xp = jnp.pad(x.astype(jnp.bfloat16), ((0, 0), (1, 1), (1, 1), (0, 0)))
    taps = [xp[:, th:th + H + 1, tw:tw + W + 1, :]
            for th in range(2) for tw in range(2)]
    a = jnp.concatenate(taps, axis=-1).reshape(N * (H + 1) * (W + 1), 4 * C)
    out = gemm_fused(a, w_p, bias_p, 4 * cout, out_act, out_dtype)
    out = out.reshape(N, H + 1, W + 1, 2, 2, cout)
    out = jnp.transpose(out, (0, 1, 3, 2, 4, 5)).reshape(N, 2 * H + 2, 2 * W + 2, cout)
    return out[:, 1:2 * H + 1, 1:2 * W + 1, :]


# ---------------------------------------------------------------------------
# BatchNorm2d (training-mode batch stats, eps=1e-5), tiled two-pass,
# bf16 in / bf16 out, f32 statistics, optional fused ELU epilogue.
# ---------------------------------------------------------------------------
def _bn_tiles(M):
    cap = 2048 if _BIG_VMEM else 1024
    n = max(1, _cdiv(M, cap))
    TR = _round_up(_cdiv(M, n), 16)
    return TR, TR * n


def batchnorm_nhwc(x, gamma_p, beta_p, out_act=None, out_dtype=jnp.bfloat16):
    N, H, W, C = x.shape
    M = N * H * W
    Cp = gamma_p.shape[1]
    TR, Mp = _bn_tiles(M)
    x2 = x.reshape(M, C)
    if Mp != M or Cp != C:
        x2 = jnp.pad(x2, ((0, Mp - M), (0, Cp - C)))   # zero rows don't bias sums

    CB = 256 if Cp % 256 == 0 else 128                 # channel-parallel stats blocks
    stats_sum, stats_sq = pl.pallas_call(
        _bn_stats_kernel,
        out_shape=(jax.ShapeDtypeStruct((1, Cp), jnp.float32),
                   jax.ShapeDtypeStruct((1, Cp), jnp.float32)),
        grid_spec=pltpu.PrefetchScalarGridSpec(
            num_scalar_prefetch=0, grid=(Cp // CB, Mp // TR),
            in_specs=[pl.BlockSpec((TR, CB), lambda c, i: (i, c))],
            out_specs=(pl.BlockSpec((1, CB), lambda c, i: (0, c)),
                       pl.BlockSpec((1, CB), lambda c, i: (0, c))),
        ),
        compiler_params=pltpu.CompilerParams(
            dimension_semantics=("parallel", "arbitrary"),
            vmem_limit_bytes=_VMEM_LIMIT),
    )(x2)

    out = pl.pallas_call(
        _make_bn_norm_kernel(1.0 / M, out_act),
        out_shape=jax.ShapeDtypeStruct((Mp, Cp), out_dtype),
        grid_spec=pltpu.PrefetchScalarGridSpec(
            num_scalar_prefetch=0, grid=(Mp // TR,),
            in_specs=[pl.BlockSpec((TR, Cp), lambda i: (i, 0)),
                      pl.BlockSpec((1, Cp), lambda i: (0, 0)),
                      pl.BlockSpec((1, Cp), lambda i: (0, 0)),
                      pl.BlockSpec((1, Cp), lambda i: (0, 0)),
                      pl.BlockSpec((1, Cp), lambda i: (0, 0))],
            out_specs=pl.BlockSpec((TR, Cp), lambda i: (i, 0)),
        ),
        compiler_params=pltpu.CompilerParams(
            dimension_semantics=("parallel",),
            vmem_limit_bytes=_VMEM_LIMIT),
    )(x2, stats_sum, stats_sq, gamma_p, beta_p)
    return out[:M, :C].reshape(N, H, W, C)


# ---------------------------------------------------------------------------
# Weight packing (hoisted out of the forward pass)
# ---------------------------------------------------------------------------
def _pack_conv_w(w_oihw):                       # Conv2d (Cout,Cin,4,4) -> (Kp,Np) bf16
    cout, cin = w_oihw.shape[:2]
    wmat = jnp.transpose(w_oihw, (2, 3, 1, 0)).reshape(16 * cin, cout)
    Kp, Np = _round_up(16 * cin, 128), _round_up(cout, 128)
    return jnp.pad(wmat, ((0, Kp - 16 * cin), (0, Np - cout))).astype(jnp.bfloat16)


def _pack_convt_w(w_iohw):                      # ConvT (Cin,Cout,4,4) -> (Kp, 4*Cout padded) bf16
    cin, cout = w_iohw.shape[:2]
    rows = []
    for th in range(2):                          # window tap (th, tw) on padded input
        for tw in range(2):
            cols = []
            for a in range(2):                   # sub-pixel output group (a, b)
                for b in range(2):
                    kh, kw = 2 + a - 2 * th, 2 + b - 2 * tw
                    cols.append(w_iohw[:, :, kh, kw])
            rows.append(jnp.concatenate(cols, axis=1))
    wmat = jnp.concatenate(rows, axis=0)         # (4*Cin, 4*Cout)
    Kp, Np = _round_up(4 * cin, 128), _round_up(4 * cout, 128)
    return jnp.pad(wmat, ((0, Kp - 4 * cin), (0, Np - 4 * cout))).astype(jnp.bfloat16)


def _pack_row(v, cols):
    return jnp.pad(v.astype(jnp.float32), (0, cols - v.shape[0])).reshape(1, cols)


# ---------------------------------------------------------------------------
# UNet construction (mirrors UnetDescriminator / UnetSkipConnectionBlock)
# ---------------------------------------------------------------------------
def build_unet_params(key, input_nc, output_nc, num_downs, ngf):
    cfgs = [dict(kind='innermost', in_nc=ngf * 8, inner=ngf * 8, outer=ngf * 8)]
    for _ in range(num_downs - 5):
        cfgs.append(dict(kind='mid', in_nc=ngf * 8, inner=ngf * 8, outer=ngf * 8))
    cfgs.append(dict(kind='mid', in_nc=ngf * 4, inner=ngf * 8, outer=ngf * 4))
    cfgs.append(dict(kind='mid', in_nc=ngf * 2, inner=ngf * 4, outer=ngf * 2))
    cfgs.append(dict(kind='mid', in_nc=ngf,     inner=ngf * 2, outer=ngf))
    cfgs.append(dict(kind='outermost', in_nc=input_nc, inner=ngf, outer=output_nc))

    blocks = []
    for cfg in cfgs:
        key, k1, k2, k3 = jax.random.split(key, 4)
        inner, outer, in_nc = cfg['inner'], cfg['outer'], cfg['in_nc']
        up_in = inner if cfg['kind'] == 'innermost' else inner * 2
        blk = dict(cfg)
        dw = 0.05 * jax.random.normal(k1, (inner, in_nc, 4, 4), jnp.float32)
        uw = 0.05 * jax.random.normal(k2, (up_in, outer, 4, 4), jnp.float32)
        blk['dw_p'] = _pack_conv_w(dw)                       # Conv2d(..., bias=False)
        blk['uw_p'] = _pack_convt_w(uw)
        if cfg['kind'] == 'outermost':                       # only layer with a bias
            ub = 0.05 * jax.random.normal(k3, (outer,), jnp.float32)
            blk['ub_p'] = _pack_row(jnp.tile(ub, 4), blk['uw_p'].shape[1])
        else:
            blk['ub_p'] = None
        if cfg['kind'] == 'mid':                             # downnorm (gamma=1, beta=0)
            cp = _round_up(inner, 128)
            blk['dn_g_p'] = _pack_row(jnp.ones((inner,), jnp.float32), cp)
            blk['dn_b_p'] = _pack_row(jnp.zeros((inner,), jnp.float32), cp)
        if cfg['kind'] != 'outermost':                       # upnorm
            cp = _round_up(outer, 128)
            blk['up_g_p'] = _pack_row(jnp.ones((outer,), jnp.float32), cp)
            blk['up_b_p'] = _pack_row(jnp.zeros((outer,), jnp.float32), cp)
        blocks.append(blk)
    return blocks


def unet_forward_nhwc(blocks, x):
    # Restructured recursion: `run(idx, e)` receives e = ELU(block input) and
    # returns ELU(cat[input, up-branch]) -- exactly what the parent's uprelu
    # would produce -- with every ELU fused into its producer's epilogue
    # (ELU(cat[a,b]) == cat[ELU(a), ELU(b)], so the skip concat stays exact).
    def run(idx, e):
        blk = blocks[idx]
        if blk['kind'] == 'innermost':
            # original: [ELU, downconv, ELU, upconv, BN] + skip concat (+ parent ELU)
            d = conv2d_s2(e, blk['dw_p'], None, blk['inner'], out_act='elu')
            u = conv_transpose2d_s2(d, blk['uw_p'], None, blk['outer'])
            h = batchnorm_nhwc(u, blk['up_g_p'], blk['up_b_p'], out_act='elu')
            return jnp.concatenate([e, h], axis=-1)
        # mid: [ELU, downconv, BN, submodule, ELU, upconv, BN] + skip concat (+ parent ELU)
        d = conv2d_s2(e, blk['dw_p'], None, blk['inner'])
        d = batchnorm_nhwc(d, blk['dn_g_p'], blk['dn_b_p'], out_act='elu')
        s = run(idx - 1, d)
        u = conv_transpose2d_s2(s, blk['uw_p'], None, blk['outer'])
        h = batchnorm_nhwc(u, blk['up_g_p'], blk['up_b_p'], out_act='elu')
        return jnp.concatenate([e, h], axis=-1)

    top = blocks[-1]   # outermost: [downconv, submodule, ELU, upconv(+bias), Tanh]
    h0 = conv2d_s2(x, top['dw_p'], None, top['inner'], out_act='elu')
    s = run(len(blocks) - 2, h0)
    return conv_transpose2d_s2(s, top['uw_p'], top['ub_p'], top['outer'],
                               out_act='tanh', out_dtype=jnp.float32)


def unet_discriminator(blocks, x_nchw):
    x = jnp.transpose(x_nchw, (0, 2, 3, 1))      # NCHW -> NHWC
    y = unet_forward_nhwc(blocks, x)
    return jnp.transpose(y, (0, 3, 1, 2))        # NHWC -> NCHW


# ---------------------------------------------------------------------------
# Self-test of the conv primitives against lax references (bf16-cast operands)
# ---------------------------------------------------------------------------
def _self_test(key):
    k1, k2, k3, k4 = jax.random.split(key, 4)
    N, H, W, Ci, Co = 1, 8, 8, 8, 16
    x = jax.random.normal(k1, (N, H, W, Ci), jnp.float32)
    xb = x.astype(jnp.bfloat16).astype(jnp.float32)

    w = 0.1 * jax.random.normal(k2, (Co, Ci, 4, 4), jnp.float32)
    wb = w.astype(jnp.bfloat16).astype(jnp.float32)
    got = conv2d_s2(x, _pack_conv_w(w), None, Co, out_dtype=jnp.float32)
    ref = lax.conv_general_dilated(
        xb, jnp.transpose(wb, (2, 3, 1, 0)), (2, 2), [(1, 1), (1, 1)],
        dimension_numbers=('NHWC', 'HWIO', 'NHWC'), precision=lax.Precision.HIGHEST)
    assert float(jnp.max(jnp.abs(got - ref))) < 1e-2, "conv2d_s2 mismatch"

    wt = 0.1 * jax.random.normal(k3, (Ci, Co, 4, 4), jnp.float32)
    bt = 0.1 * jax.random.normal(k4, (Co,), jnp.float32)
    wtb = wt.astype(jnp.bfloat16).astype(jnp.float32)
    got_t = conv_transpose2d_s2(
        x, _pack_convt_w(wt), _pack_row(jnp.tile(bt, 4), _round_up(4 * Co, 128)),
        Co, out_dtype=jnp.float32)
    ref_t = lax.conv_general_dilated(
        xb, jnp.transpose(jnp.flip(wtb, (2, 3)), (2, 3, 0, 1)), (1, 1),
        [(2, 2), (2, 2)], lhs_dilation=(2, 2),
        dimension_numbers=('NHWC', 'HWIO', 'NHWC'),
        precision=lax.Precision.HIGHEST) + bt
    assert float(jnp.max(jnp.abs(got_t - ref_t))) < 1e-2, "conv_transpose2d_s2 mismatch"


# ---------------------------------------------------------------------------
if __name__ == "__main__":
    key = jax.random.PRNGKey(0)
    ktest, kparam, kx = jax.random.split(key, 3)

    _self_test(ktest)

    input_nc, output_nc, num_downs, ngf = 3, 3, 5, 8   # small synthetic config
    N, H, W = 2, 32, 32                                # spatial >= 2**num_downs

    blocks = build_unet_params(kparam, input_nc, output_nc, num_downs, ngf)
    x = jax.random.normal(kx, (N, input_nc, H, W), jnp.float32)

    fwd = jax.jit(lambda inp: unet_discriminator(blocks, inp))
    y = jax.block_until_ready(fwd(x))
    assert y.shape == (N, output_nc, H, W), y.shape
    assert bool(jnp.all(jnp.isfinite(y)))
    print("KERNEL_OK")
</pallas_src>

<mosaic_0001>
module attributes {stable_mosaic.version = 11 : i64} {
  func.func @kernel(%arg0: i32, %arg1: i32, %arg2: memref<16x128xbf16, #tpu.memory_space<vmem>>, %arg3: memref<128x128xbf16, #tpu.memory_space<vmem>>, %arg4: memref<16x128xf32, #tpu.memory_space<vmem>>) attributes {dimension_semantics = [#tpu.dimension_semantics<parallel>, #tpu.dimension_semantics<parallel>], iteration_bounds = array<i64: 1, 1>, scalar_prefetch = 0 : i64, scratch_operands = 0 : i64, tpu.core_type = #tpu.core_type<tc>, window_params = [{transform_indices = @transform_0, window_bounds = array<i64: 16, 128>}, {transform_indices = @transform_1, window_bounds = array<i64: 128, 128>}, {transform_indices = @transform_2, window_bounds = array<i64: 16, 128>}]} {
    %c0 = arith.constant 0 : index
    %c0_0 = arith.constant 0 : index
    %0 = vector.load %arg2[%c0, %c0_0] : memref<16x128xbf16, #tpu.memory_space<vmem>>, vector<16x128xbf16>
    %c0_1 = arith.constant 0 : index
    %c0_2 = arith.constant 0 : index
    %1 = vector.load %arg3[%c0_1, %c0_2] : memref<128x128xbf16, #tpu.memory_space<vmem>>, vector<128x128xbf16>
    %cst = arith.constant dense<0.000000e+00> : vector<16x128xf32>
    %2 = tpu.matmul %0, %1, %cst {dimension_numbers = #tpu.dot_dimension_numbers<[1], [0], [0], [1], [0, 0, 1, 1], [], []>} : vector<16x128xbf16>, vector<128x128xbf16>, vector<16x128xf32> -> vector<16x128xf32>
    %c0_3 = arith.constant 0 : index
    %c0_4 = arith.constant 0 : index
    %3 = vector.load %arg4[%c0_3, %c0_4] : memref<16x128xf32, #tpu.memory_space<vmem>>, vector<16x128xf32>
    tpu.vector_store %arg4[%c0_3, %c0_4], %2 {strides = array<i32>} : memref<16x128xf32, #tpu.memory_space<vmem>>, vector<16x128xf32>,
    return
  }
  func.func @transform_0(%arg0: i32, %arg1: i32) -> (i32, i32) {
    %c0_i32 = arith.constant 0 : i32
    %c0_i32_0 = arith.constant 0 : i32
    return %arg0, %c0_i32 : i32, i32
  }
  func.func @transform_1(%arg0: i32, %arg1: i32) -> (i32, i32) {
    %c0_i32 = arith.constant 0 : i32
    %c0_i32_0 = arith.constant 0 : i32
    return %c0_i32, %arg1 : i32, i32
  }
  func.func @transform_2(%arg0: i32, %arg1: i32) -> (i32, i32) {
    %c0_i32 = arith.constant 0 : i32
    return %arg0, %arg1 : i32, i32
  }
}

</mosaic_0001>

<bundles_post_ra>
// kernel: tpu_custom_call.1
= control target key start
LH: loop header
LB: loop body
LE: loop exit
PB: predicated region body
PF: predicated region fallthrough
CT: control target
= control target key end

     0   :  { %7 = vsyncpa [#allocation3], 0  ;;  %s313_s0 = inlined_call_operand.hbm [shape: bf16[16,128], index: 0, kind: input, shape index: {}]   ;;  %s314_s1 = inlined_call_operand.hbm [shape: bf16[128,128], index: 1, kind: input, shape index: {}]   ;;  %s315_s2 = inlined_call_operand.hbm [shape: f32[16,128], index: 2, kind: output, shape index: {}]  }
   0x1   :  { %8 = vsyncpa [#allocation6], 0 }
   0x2   :  { %9 = vsyncpa [#allocation4], 0  ;;  %s14_s11 = sshll.u32 %s313_s0, 4  ;;  %s282_s12 = smov [#allocation2]   ;;  %s15_s11 = int_to_ptr.hbm [resolvable:$true] %s14_s11 }
   0x3   :  { %s16_s13 = sshll.u32 %s282_s12, 4  ;;  %s27_s16 = sshll.u32 %s314_s1, 4  ;;  %s17_s13 = int_to_ptr.vmem [resolvable:$true] %s16_s13  ;;  %s28_s16 = int_to_ptr.hbm [resolvable:$true] %s27_s16 }
   0x4   :  { %s283_s17 = smov 64   ;;  %s284_s18 = smov 4  }
   0x5   :  { %22 = dma.hbm_to_vmem [thread:$0]  %s15_s11, 128, %s17_s13, [#allocation3], %s283_s17, %s283_s17, %s284_s18  }
   0x6   :  { %s285_s19 = smov [#allocation5]  }
   0x7   :  { %s29_s20 = sshll.u32 %s285_s19, 4  ;;  %s30_s20 = int_to_ptr.vmem [resolvable:$true] %s29_s20 }
   0x8   :  { %35 = dma.hbm_to_vmem [thread:$0]  %s28_s16, 1024, %s30_s20, [#allocation6], %s283_s17, %s283_s17, %s284_s18  }
   0x9   :  { %276 = dma.done.wait [#allocation3], 128  }
   0xa   :  { %277 = vsyncadd [#allocation3], 4294967168 }
   0xb   :  { %278 = dma.done.wait [#allocation6], 1024  }
   0xc   :  { %279 = vsyncadd [#allocation6], 4294966272  ;;  %v196_v0 = vld [vmem:[#allocation5 + $0x38] sm:$0xff]  ;;  %v195_v1 = vld [vmem:[#allocation5 + $0x30] sm:$0xff]  ;;  %s286_s0 = smov [#allocation7]   ;;  %s138_s23 = sshll.u32 %s315_s2, 4  ;;  %s139_s23 = int_to_ptr.hbm [resolvable:$true] %s138_s23 }
   0xd   :  { %116 = vmatpush.bf16.msra.mxu0 %v196_v0  ;;  %v194_v2 = vld [vmem:[#allocation5 + $0x28] sm:$0xff]  ;;  %v193_v3 = vld [vmem:[#allocation5 + $0x20] sm:$0xff]  ;;  %v192_v4 = vld [vmem:[#allocation5 + $0x18] sm:$0xff]  ;;  %s136_s1 = sshll.u32 %s286_s0, 4  ;;  %s287_s24 = smov 128   ;;  %s137_s1 = int_to_ptr.vmem [resolvable:$true] %s136_s1 }
   0xe   :  { %v191_v5 = vld [vmem:[#allocation5 + $0x10] sm:$0xff]  ;;  %v190_v6 = vld [vmem:[#allocation5 + $0x8] sm:$0xff]  ;;  %v189_v7 = vld [vmem:[#allocation5] sm:$0xff]  ;;  %s288_s25 = smov 8  }
   0xf   :  { %v188_v8 = vld [vmem:[#allocation2] sm:$0xff] }
  0x11   :  { %117 = vmatpush.bf16.msra.mxu0 %v195_v1 }
  0x15   :  { %118 = vmatpush.bf16.msra.mxu0 %v194_v2 }
  0x19   :  { %119 = vmatpush.bf16.msra.mxu0 %v193_v3 }
  0x1d   :  { %120 = vmatpush.bf16.msra.mxu0 %v192_v4 }
  0x21   :  { %121 = vmatpush.bf16.msra.mxu0 %v191_v5 }
  0x25   :  { %122 = vmatpush.bf16.msra.mxu0 %v190_v6 }
  0x29   :  { %123 = vmatpush.bf16.msra.mxu0 %v189_v7 }
  0x2c   :  { %124 = vmatmul.bf16.vlgmr.msra.gmra.mxu0 %v188_v8 }
  0xa9   :  { %v125_v9 = vpop.f32.mrf.mxu0 }
  0xaa   :  { %130 = vst [vmem:[#allocation7] sm:$0xff] %v125_v9 }
  0xb1   :  { %v127_v10 = vpop.f32.mrf.mxu0 }
  0xb2   :  { %131 = vst [vmem:[#allocation7 + $0x8] sm:$0xff] %v127_v10 }
  0xb3   :  { %144 = dma.vmem_to_hbm [thread:$0]  %s137_s1, 256, %s139_s23, [#allocation4], %s287_s24, %s287_s24, %s288_s25  }
  0xb4   :  { %280 = dma.done.wait [#allocation4], 256  }
  0xb5   :  { %281 = vsyncadd [#allocation4], 4294967040 }
  0xb6   :  { %149 = vsyncpa [#allocation3], 1 }
  0xb7   :  { %150 = vsyncpa [#allocation6], 1 }
  0xb8   :  { %151 = vsyncpa [#allocation4], 1 }

</bundles_post_ra>
